<compile_context>
chip_gen: v7x
topology: tpu7x:2x2x1
jax: 0.10.0
libtpu: 0.0.40
codegen_flags: <defaults>
</compile_context>

<pallas_src>
import functools
import math

import jax
import jax.numpy as jnp
from jax import lax
from jax.experimental import pallas as pl
from jax.experimental.pallas import tpu as pltpu


# ---------------------------------------------------------------------------
# Kernel
# ---------------------------------------------------------------------------
def _flash_mha_kernel(
    nblk_ref,                        # scalar prefetch: per-batch #valid kv tiles
    q_ref, k_ref, v_ref, bias_ref,   # inputs  (VMEM blocks)
    o_ref,                           # output  (VMEM block)
    m_scr, l_scr, acc_scr,           # scratch (persist across kv steps)
    *, exp_in_bf16):
    """Flash (online-softmax) MHA; all heads batched in one dot_general.

    grid = (batch, q_tiles, kv_tiles); the kv axis is the sequential reduction.
      q_ref        : (1, H, TQ, D)  RoPE + 1/sqrt(D) already applied (wrapper)
      k_ref/v_ref  : (1, H, TK, D)  RoPE already applied to k (wrapper)
      bias_ref     : (1, 1, TK)     additive key-padding bias (0 / -1e30), f32
      o_ref        : (1, H, TQ, D)
      m/l/acc scr  : (H, TQ, 1/1/D) online-softmax running state, f32
    """
    b = pl.program_id(0)
    ki = pl.program_id(2)
    nkv = pl.num_programs(2)

    @pl.when(ki == 0)
    def _init():
        m_scr[...] = jnp.full(m_scr.shape, -jnp.inf, dtype=jnp.float32)
        l_scr[...] = jnp.zeros(l_scr.shape, dtype=jnp.float32)
        acc_scr[...] = jnp.zeros(acc_scr.shape, dtype=jnp.float32)

    # Skip kv tiles past the last tile that contains any valid key.  For rows
    # whose mask is entirely zero the wrapper sets nblk = nkv so that the
    # reference's "uniform over all keys" behaviour is reproduced.
    @pl.when(ki < nblk_ref[b])
    def _accumulate():
        q = q_ref[0]                       # (H, TQ, D)
        k = k_ref[0]                       # (H, TK, D)
        v = v_ref[0]                       # (H, TK, D)

        # Batched QK^T over all heads (H is the batch dim), f32 accumulation.
        s = jnp.einsum("hqd,hkd->hqk", q, k,
                       preferred_element_type=jnp.float32)   # (H, TQ, TK)
        s = s + bias_ref[...]              # (1, 1, TK) broadcasts over (H, TQ)

        m_prev = m_scr[...]                # (H, TQ, 1)
        m_new = jnp.maximum(m_prev, jnp.max(s, axis=-1, keepdims=True))
        alpha = jnp.exp(m_prev - m_new)
        if exp_in_bf16:                    # bf16 EUP path (v6e / v7x)
            p = jnp.exp((s - m_new).astype(jnp.bfloat16))
        else:
            p = jnp.exp(s - m_new)
        l_scr[...] = alpha * l_scr[...] + jnp.sum(
            p.astype(jnp.float32), axis=-1, keepdims=True)
        acc_scr[...] = alpha * acc_scr[...] + jnp.einsum(
            "hqk,hkd->hqd", p.astype(v.dtype), v,
            preferred_element_type=jnp.float32)
        m_scr[...] = m_new

    @pl.when(ki == nkv - 1)
    def _finalize():
        inv_l = pl.reciprocal(l_scr[...], approx=False)   # exact; tiny tensor
        o_ref[0] = (acc_scr[...] * inv_l).astype(o_ref.dtype)


# ---------------------------------------------------------------------------
# Wrapper / glue
# ---------------------------------------------------------------------------
def _rope_tables(S, D):
    half = D // 2
    inv_freq = 1.0 / (10000.0 ** (jnp.arange(half, dtype=jnp.float32) / half))
    ang = jnp.arange(S, dtype=jnp.float32)[:, None] * inv_freq[None, :]   # (S, half)
    cos = jnp.concatenate([jnp.cos(ang), jnp.cos(ang)], axis=-1)          # (S, D)
    sign = jnp.concatenate([-jnp.ones((S, half), jnp.float32),
                            jnp.ones((S, half), jnp.float32)], axis=-1)
    sin_signed = sign * jnp.concatenate([jnp.sin(ang), jnp.sin(ang)], axis=-1)
    return cos, sin_signed


def _tpu_defaults():
    """(tq, tk, vmem_limit_bytes) per TPU generation; conservative fallback."""
    kind = ""
    try:
        kind = jax.devices()[0].device_kind.lower()
    except Exception:
        pass
    mib = 1024 * 1024
    if "v6" in kind:
        # v6e: 128 MiB VMEM, 2x256^2 MXU -> 256-wide tiles fill the MXU.
        return 256, 256, 64 * mib
    if "v5" in kind and ("lite" in kind or "v5e" in kind):
        # v5e: 128 MiB VMEM, lowest HBM BW -> bigger q tile (fewer K/V passes),
        # 4x128^2 MXU -> tk=128.
        return 512, 128, 96 * mib
    # v7x (64 MiB physical VMEM) and unknown chips: conservative budget.
    return 256, 256, 48 * mib


def _choose_tile(S, pref):
    t = min(pref, S)
    if S % t == 0:
        return t
    for cand in range(t, 0, -1):
        if S % cand == 0 and (cand % 8 == 0 or cand == S):
            return cand
    return S


def attention_with_rope(x, mask, params, num_heads, *, tq=None, tk=None,
                        vmem_limit_bytes=None):
    B, S, E = x.shape
    H = num_heads
    assert E % H == 0
    D = E // H
    assert D % 2 == 0
    cdtype = x.dtype

    d_tq, d_tk, d_vmem = _tpu_defaults()
    tq = _choose_tile(S, d_tq if tq is None else tq)
    tk = _choose_tile(S, d_tk if tk is None else tk)
    vmem_limit_bytes = d_vmem if vmem_limit_bytes is None else vmem_limit_bytes
    nq, nkv = S // tq, S // tk

    # Full f32 matmul precision for the f32 path (accuracy baseline); default
    # (bf16 MXU with f32 accumulation) for bf16 inputs.
    prec = lax.Precision.HIGHEST if cdtype == jnp.float32 else lax.Precision.DEFAULT

    # --- QKV projection directly into (B, H, S, D); weights in model dtype ---
    w3 = params["w_in"].astype(cdtype).reshape(3, H, D, E)
    b3 = params["b_in"].astype(cdtype).reshape(3, 1, H, 1, D)
    q = jnp.einsum("bse,hde->bhsd", x, w3[0], precision=prec) + b3[0]
    k = jnp.einsum("bse,hde->bhsd", x, w3[1], precision=prec) + b3[1]
    v = jnp.einsum("bse,hde->bhsd", x, w3[2], precision=prec) + b3[2]

    # --- RoPE in the wrapper (fused by XLA); 1/sqrt(D) folded into q tables ---
    scale = 1.0 / math.sqrt(D)
    cos, sin = _rope_tables(S, D)

    def rope(t, c, s_):
        return t * c.astype(t.dtype) + jnp.roll(t, D // 2, axis=-1) * s_.astype(t.dtype)

    q = rope(q, cos * scale, sin * scale)
    k = rope(k, cos, sin)

    # --- key_padding_mask = 1 - mask -> additive bias: 0 valid, -1e30 masked ---
    bias = jnp.where(mask > 0.5, 0.0, -1e30).astype(jnp.float32).reshape(B, 1, S)

    # --- per-batch count of kv tiles up to the last one with any valid key ---
    tile_valid = (mask.reshape(B, nkv, tk) > 0.5).any(axis=-1)            # (B, nkv)
    tile_no = jnp.arange(1, nkv + 1, dtype=jnp.int32)
    kv_nblk = jnp.max(jnp.where(tile_valid, tile_no, 0), axis=-1)
    kv_nblk = jnp.where(kv_nblk == 0, nkv, kv_nblk).astype(jnp.int32)     # all-masked rows

    kernel = functools.partial(_flash_mha_kernel,
                               exp_in_bf16=(cdtype == jnp.bfloat16))

    out = pl.pallas_call(
        kernel,
        out_shape=jax.ShapeDtypeStruct((B, H, S, D), cdtype),
        grid_spec=pltpu.PrefetchScalarGridSpec(
            num_scalar_prefetch=1,
            grid=(B, nq, nkv),
            in_specs=[
                pl.BlockSpec((1, H, tq, D),
                             lambda b, qi, ki, nblk: (b, 0, qi, 0)),
                pl.BlockSpec((1, H, tk, D),
                             lambda b, qi, ki, nblk: (b, 0, jnp.minimum(ki, nblk[b] - 1), 0)),
                pl.BlockSpec((1, H, tk, D),
                             lambda b, qi, ki, nblk: (b, 0, jnp.minimum(ki, nblk[b] - 1), 0)),
                pl.BlockSpec((1, 1, tk),
                             lambda b, qi, ki, nblk: (b, 0, jnp.minimum(ki, nblk[b] - 1))),
            ],
            out_specs=pl.BlockSpec((1, H, tq, D),
                                   lambda b, qi, ki, nblk: (b, 0, qi, 0)),
            scratch_shapes=[
                pltpu.VMEM((H, tq, 1), jnp.float32),   # running max
                pltpu.VMEM((H, tq, 1), jnp.float32),   # running denom
                pltpu.VMEM((H, tq, D), jnp.float32),   # running numerator
            ],
        ),
        compiler_params=pltpu.CompilerParams(
            dimension_semantics=("parallel", "parallel", "arbitrary"),
            vmem_limit_bytes=vmem_limit_bytes,
        ),
    )(kv_nblk, q, k, v, bias)

    # --- output projection straight from (B, H, S, D); no explicit transpose ---
    w_out = params["w_out"].astype(cdtype).reshape(E, H, D)
    b_out = params["b_out"].astype(cdtype)
    return jnp.einsum("bhsd,fhd->bsf", out, w_out, precision=prec) + b_out


# ---------------------------------------------------------------------------
# Pure-JAX reference (same math) for correctness checking
# ---------------------------------------------------------------------------
def attention_with_rope_reference(x, mask, params, num_heads):
    B, S, E = x.shape
    H = num_heads
    D = E // H
    hp = lax.Precision.HIGHEST
    xf = x.astype(jnp.float32)
    qkv = jnp.einsum("bse,fe->bsf", xf, params["w_in"], precision=hp) + params["b_in"]
    q, k, v = jnp.split(qkv, 3, axis=-1)

    def to_heads(t):
        return t.reshape(B, S, H, D).transpose(0, 2, 1, 3)

    q, k, v = to_heads(q), to_heads(k), to_heads(v)
    cos, sin = _rope_tables(S, D)

    def rope(t):
        return t * cos + jnp.roll(t, D // 2, axis=-1) * sin

    q, k = rope(q), rope(k)
    s = jnp.einsum("bhqd,bhkd->bhqk", q, k, precision=hp) / jnp.sqrt(jnp.float32(D))
    s = jnp.where(mask[:, None, None, :] > 0.5, s, -1e30)
    p = jax.nn.softmax(s, axis=-1)
    o = jnp.einsum("bhqk,bhkd->bhqd", p, v, precision=hp)
    o = o.transpose(0, 2, 1, 3).reshape(B, S, E)
    return jnp.einsum("bse,fe->bsf", o, params["w_out"], precision=hp) + params["b_out"]


def _make_params(key, E):
    k1, k2, k3, k4 = jax.random.split(key, 4)
    return {
        "w_in": 0.05 * jax.random.normal(k1, (3 * E, E), jnp.float32),
        "b_in": 0.01 * jax.random.normal(k2, (3 * E,), jnp.float32),
        "w_out": 0.05 * jax.random.normal(k3, (E, E), jnp.float32),
        "b_out": 0.01 * jax.random.normal(k4, (E,), jnp.float32),
    }


if __name__ == "__main__":
    root = jax.random.PRNGKey(0)
    k_small, k_big, kx1, kx2 = jax.random.split(root, 4)

    # --- test 1: small module-scale shapes, f32, single tile ------------------
    B, S, E, H = 2, 8, 32, 4
    params = _make_params(k_small, E)
    x = jax.random.normal(kx1, (B, S, E), jnp.float32)
    mask = jnp.ones((B, S), jnp.float32).at[1, 6:].set(0.0)   # pad 2 keys of row 1

    out = jax.block_until_ready(attention_with_rope(x, mask, params, H))
    ref = attention_with_rope_reference(x, mask, params, H)
    assert out.shape == (B, S, E)
    assert bool(jnp.all(jnp.isfinite(out)))
    err1 = float(jnp.max(jnp.abs(out - ref)))
    assert bool(jnp.allclose(out, ref, atol=2e-3, rtol=2e-3)), err1

    # --- test 2: multi-tile flash path + trailing-KV-tile skipping, f32 ------
    B2, S2, E2, H2 = 2, 256, 64, 4
    params2 = _make_params(k_big, E2)
    x2 = jax.random.normal(kx2, (B2, S2, E2), jnp.float32)
    # Row 1 is padded from key 100 -> with tk=128 its second kv tile is fully
    # masked and gets skipped via the scalar-prefetched tile counts.
    mask2 = jnp.ones((B2, S2), jnp.float32).at[1, 100:].set(0.0)

    out2 = jax.block_until_ready(
        attention_with_rope(x2, mask2, params2, H2, tq=128, tk=128))
    ref2 = attention_with_rope_reference(x2, mask2, params2, H2)
    err2 = float(jnp.max(jnp.abs(out2 - ref2)))
    assert bool(jnp.allclose(out2, ref2, atol=2e-3, rtol=2e-3)), err2

    # --- test 3: bf16 inputs, device-default tiling (bf16 MXU + bf16 exp) ----
    out3 = jax.block_until_ready(
        attention_with_rope(x2.astype(jnp.bfloat16), mask2, params2, H2))
    out3_f32 = out3.astype(jnp.float32)
    assert out3.shape == (B2, S2, E2)
    assert bool(jnp.all(jnp.isfinite(out3_f32)))
    err3 = float(jnp.max(jnp.abs(out3_f32 - ref2)))
    assert err3 < 1e-1, err3   # end-to-end bf16 path: looser tolerance

    print("KERNEL_OK")
</pallas_src>

<mosaic_0001>
module attributes {stable_mosaic.version = 11 : i64} {
  func.func @_flash_mha_kernel(%arg0: i32, %arg1: i32, %arg2: i32, %arg3: memref<2xi32, #tpu.memory_space<smem>>, %arg4: memref<1x4x8x8xf32, #tpu.memory_space<vmem>>, %arg5: memref<1x4x8x8xf32, #tpu.memory_space<vmem>>, %arg6: memref<1x4x8x8xf32, #tpu.memory_space<vmem>>, %arg7: memref<1x1x8xf32, #tpu.memory_space<vmem>>, %arg8: memref<1x4x8x8xf32, #tpu.memory_space<vmem>>, %arg9: memref<4x8x1xf32, #tpu.memory_space<vmem>>, %arg10: memref<4x8x1xf32, #tpu.memory_space<vmem>>, %arg11: memref<4x8x8xf32, #tpu.memory_space<vmem>>) attributes {dimension_semantics = [#tpu.dimension_semantics<parallel>, #tpu.dimension_semantics<parallel>, #tpu.dimension_semantics<arbitrary>], iteration_bounds = array<i64: 2, 1, 1>, scalar_prefetch = 1 : i64, scratch_operands = 3 : i64, tpu.core_type = #tpu.core_type<tc>, window_params = [{transform_indices = @transform_0, window_bounds = array<i64: 1, 4, 8, 8>}, {transform_indices = @transform_1, window_bounds = array<i64: 1, 4, 8, 8>}, {transform_indices = @transform_2, window_bounds = array<i64: 1, 4, 8, 8>}, {transform_indices = @transform_3, window_bounds = array<i64: 1, 1, 8>}, {transform_indices = @transform_4, window_bounds = array<i64: 1, 4, 8, 8>}]} {
    %c0_i32 = arith.constant 0 : i32
    %0 = arith.cmpi eq, %arg2, %c0_i32 : i32
    %1 = arith.extui %0 : i1 to i32
    %c0_i32_0 = arith.constant 0 : i32
    %2 = arith.cmpi ne, %1, %c0_i32_0 : i32
    scf.if %2 {
      %cst = arith.constant 0xFF800000 : f32
      %11 = vector.broadcast %cst : f32 to vector<4x8x1xf32>
      %c0 = arith.constant 0 : index
      %c0_4 = arith.constant 0 : index
      %c0_5 = arith.constant 0 : index
      %12 = vector.load %arg9[%c0, %c0_4, %c0_5] : memref<4x8x1xf32, #tpu.memory_space<vmem>>, vector<4x8x1xf32>
      tpu.vector_store %arg9[%c0, %c0_4, %c0_5], %11 {strides = array<i32>} : memref<4x8x1xf32, #tpu.memory_space<vmem>>, vector<4x8x1xf32>,
      %cst_6 = arith.constant 0.000000e+00 : f32
      %13 = vector.broadcast %cst_6 : f32 to vector<4x8x1xf32>
      %c0_7 = arith.constant 0 : index
      %c0_8 = arith.constant 0 : index
      %c0_9 = arith.constant 0 : index
      %14 = vector.load %arg10[%c0_7, %c0_8, %c0_9] : memref<4x8x1xf32, #tpu.memory_space<vmem>>, vector<4x8x1xf32>
      tpu.vector_store %arg10[%c0_7, %c0_8, %c0_9], %13 {strides = array<i32>} : memref<4x8x1xf32, #tpu.memory_space<vmem>>, vector<4x8x1xf32>,
      %cst_10 = arith.constant 0.000000e+00 : f32
      %15 = vector.broadcast %cst_10 : f32 to vector<4x8x8xf32>
      %c0_11 = arith.constant 0 : index
      %c0_12 = arith.constant 0 : index
      %c0_13 = arith.constant 0 : index
      %16 = vector.load %arg11[%c0_11, %c0_12, %c0_13] : memref<4x8x8xf32, #tpu.memory_space<vmem>>, vector<4x8x8xf32>
      tpu.vector_store %arg11[%c0_11, %c0_12, %c0_13], %15 {strides = array<i32>} : memref<4x8x8xf32, #tpu.memory_space<vmem>>, vector<4x8x8xf32>,
    } else {
    }
    %3 = arith.index_cast %arg0 : i32 to index
    %4 = memref.load %arg3[%3] : memref<2xi32, #tpu.memory_space<smem>>
    %5 = arith.cmpi slt, %arg2, %4 : i32
    %6 = arith.extui %5 : i1 to i32
    %c0_i32_1 = arith.constant 0 : i32
    %7 = arith.cmpi ne, %6, %c0_i32_1 : i32
    scf.if %7 {
      %c0 = arith.constant 0 : index
      %c0_4 = arith.constant 0 : index
      %c0_5 = arith.constant 0 : index
      %c0_6 = arith.constant 0 : index
      %11 = vector.load %arg4[%c0, %c0_4, %c0_5, %c0_6] : memref<1x4x8x8xf32, #tpu.memory_space<vmem>>, vector<1x4x8x8xf32>
      %12 = vector.shape_cast %11 : vector<1x4x8x8xf32> to vector<4x8x8xf32>
      %c0_7 = arith.constant 0 : index
      %c0_8 = arith.constant 0 : index
      %c0_9 = arith.constant 0 : index
      %c0_10 = arith.constant 0 : index
      %13 = vector.load %arg5[%c0_7, %c0_8, %c0_9, %c0_10] : memref<1x4x8x8xf32, #tpu.memory_space<vmem>>, vector<1x4x8x8xf32>
      %14 = vector.shape_cast %13 : vector<1x4x8x8xf32> to vector<4x8x8xf32>
      %c0_11 = arith.constant 0 : index
      %c0_12 = arith.constant 0 : index
      %c0_13 = arith.constant 0 : index
      %c0_14 = arith.constant 0 : index
      %15 = vector.load %arg6[%c0_11, %c0_12, %c0_13, %c0_14] : memref<1x4x8x8xf32, #tpu.memory_space<vmem>>, vector<1x4x8x8xf32>
      %16 = vector.shape_cast %15 : vector<1x4x8x8xf32> to vector<4x8x8xf32>
      "tpu.trace_start"() <{level = 10 : i32, message = "hqd,hkd->hqk"}> : () -> ()
      %cst = arith.constant dense<0.000000e+00> : vector<4x8x8xf32>
      %17 = tpu.matmul %12, %14, %cst {dimension_numbers = #tpu.dot_dimension_numbers<[2], [2], [1], [1], [0, 0, 0, 1, 1, 1], [0], [0]>} : vector<4x8x8xf32>, vector<4x8x8xf32>, vector<4x8x8xf32> -> vector<4x8x8xf32>
      "tpu.trace_stop"() : () -> ()
      %c0_15 = arith.constant 0 : index
      %c0_16 = arith.constant 0 : index
      %c0_17 = arith.constant 0 : index
      %18 = vector.load %arg7[%c0_15, %c0_16, %c0_17] : memref<1x1x8xf32, #tpu.memory_space<vmem>>, vector<1x1x8xf32>
      %19 = vector.broadcast %18 : vector<1x1x8xf32> to vector<4x8x8xf32>
      %20 = arith.addf %17, %19 : vector<4x8x8xf32>
      %c0_18 = arith.constant 0 : index
      %c0_19 = arith.constant 0 : index
      %c0_20 = arith.constant 0 : index
      %21 = vector.load %arg9[%c0_18, %c0_19, %c0_20] : memref<4x8x1xf32, #tpu.memory_space<vmem>>, vector<4x8x1xf32>
      %cst_21 = arith.constant dense<0xFF800000> : vector<4x8xf32>
      %22 = vector.multi_reduction <maximumf>, %20, %cst_21 [2] : vector<4x8x8xf32> to vector<4x8xf32>
      %23 = vector.shape_cast %22 : vector<4x8xf32> to vector<4x8x1xf32>
      %24 = arith.maximumf %21, %23 : vector<4x8x1xf32>
      %25 = arith.subf %21, %24 : vector<4x8x1xf32>
      %26 = math.exp %25 : vector<4x8x1xf32>
      %27 = vector.broadcast %24 : vector<4x8x1xf32> to vector<4x8x8xf32>
      %28 = arith.subf %20, %27 : vector<4x8x8xf32>
      %29 = math.exp %28 : vector<4x8x8xf32>
      %c0_22 = arith.constant 0 : index
      %c0_23 = arith.constant 0 : index
      %c0_24 = arith.constant 0 : index
      %30 = vector.load %arg10[%c0_22, %c0_23, %c0_24] : memref<4x8x1xf32, #tpu.memory_space<vmem>>, vector<4x8x1xf32>
      %31 = arith.mulf %26, %30 : vector<4x8x1xf32>
      %cst_25 = arith.constant dense<0.000000e+00> : vector<4x8xf32>
      %32 = vector.multi_reduction <add>, %29, %cst_25 [2] : vector<4x8x8xf32> to vector<4x8xf32>
      %33 = vector.shape_cast %32 : vector<4x8xf32> to vector<4x8x1xf32>
      %34 = arith.addf %31, %33 : vector<4x8x1xf32>
      %c0_26 = arith.constant 0 : index
      %c0_27 = arith.constant 0 : index
      %c0_28 = arith.constant 0 : index
      %35 = vector.load %arg10[%c0_26, %c0_27, %c0_28] : memref<4x8x1xf32, #tpu.memory_space<vmem>>, vector<4x8x1xf32>
      tpu.vector_store %arg10[%c0_26, %c0_27, %c0_28], %34 {strides = array<i32>} : memref<4x8x1xf32, #tpu.memory_space<vmem>>, vector<4x8x1xf32>,
      %c0_29 = arith.constant 0 : index
      %c0_30 = arith.constant 0 : index
      %c0_31 = arith.constant 0 : index
      %36 = vector.load %arg11[%c0_29, %c0_30, %c0_31] : memref<4x8x8xf32, #tpu.memory_space<vmem>>, vector<4x8x8xf32>
      %37 = vector.broadcast %26 : vector<4x8x1xf32> to vector<4x8x8xf32>
      %38 = arith.mulf %37, %36 : vector<4x8x8xf32>
      "tpu.trace_start"() <{level = 10 : i32, message = "hqk,hkd->hqd"}> : () -> ()
      %cst_32 = arith.constant dense<0.000000e+00> : vector<4x8x8xf32>
      %39 = tpu.matmul %29, %16, %cst_32 {dimension_numbers = #tpu.dot_dimension_numbers<[2], [1], [1], [2], [0, 0, 0, 1, 1, 2], [0], [0]>} : vector<4x8x8xf32>, vector<4x8x8xf32>, vector<4x8x8xf32> -> vector<4x8x8xf32>
      "tpu.trace_stop"() : () -> ()
      %40 = arith.addf %38, %39 : vector<4x8x8xf32>
      %c0_33 = arith.constant 0 : index
      %c0_34 = arith.constant 0 : index
      %c0_35 = arith.constant 0 : index
      %41 = vector.load %arg11[%c0_33, %c0_34, %c0_35] : memref<4x8x8xf32, #tpu.memory_space<vmem>>, vector<4x8x8xf32>
      tpu.vector_store %arg11[%c0_33, %c0_34, %c0_35], %40 {strides = array<i32>} : memref<4x8x8xf32, #tpu.memory_space<vmem>>, vector<4x8x8xf32>,
      %c0_36 = arith.constant 0 : index
      %c0_37 = arith.constant 0 : index
      %c0_38 = arith.constant 0 : index
      %42 = vector.load %arg9[%c0_36, %c0_37, %c0_38] : memref<4x8x1xf32, #tpu.memory_space<vmem>>, vector<4x8x1xf32>
      tpu.vector_store %arg9[%c0_36, %c0_37, %c0_38], %24 {strides = array<i32>} : memref<4x8x1xf32, #tpu.memory_space<vmem>>, vector<4x8x1xf32>,
    } else {
    }
    %c0_i32_2 = arith.constant 0 : i32
    %8 = arith.cmpi eq, %arg2, %c0_i32_2 : i32
    %9 = arith.extui %8 : i1 to i32
    %c0_i32_3 = arith.constant 0 : i32
    %10 = arith.cmpi ne, %9, %c0_i32_3 : i32
    scf.if %10 {
      %c0 = arith.constant 0 : index
      %c0_4 = arith.constant 0 : index
      %c0_5 = arith.constant 0 : index
      %11 = vector.load %arg10[%c0, %c0_4, %c0_5] : memref<4x8x1xf32, #tpu.memory_space<vmem>>, vector<4x8x1xf32>
      %12 = tpu.reciprocal %11 : vector<4x8x1xf32> -> vector<4x8x1xf32>
      %c0_6 = arith.constant 0 : index
      %c0_7 = arith.constant 0 : index
      %c0_8 = arith.constant 0 : index
      %13 = vector.load %arg11[%c0_6, %c0_7, %c0_8] : memref<4x8x8xf32, #tpu.memory_space<vmem>>, vector<4x8x8xf32>
      %14 = vector.broadcast %12 : vector<4x8x1xf32> to vector<4x8x8xf32>
      %15 = arith.mulf %13, %14 : vector<4x8x8xf32>
      %c0_9 = arith.constant 0 : index
      %c0_10 = arith.constant 0 : index
      %c0_11 = arith.constant 0 : index
      %c0_12 = arith.constant 0 : index
      %16 = vector.load %arg8[%c0_9, %c0_10, %c0_11, %c0_12] : memref<1x4x8x8xf32, #tpu.memory_space<vmem>>, vector<1x4x8x8xf32>
      %17 = vector.shape_cast %16 : vector<1x4x8x8xf32> to vector<4x8x8xf32>
      %18 = vector.shape_cast %15 : vector<4x8x8xf32> to vector<1x4x8x8xf32>
      tpu.vector_store %arg8[%c0_9, %c0_10, %c0_11, %c0_12], %18 {strides = array<i32>} : memref<1x4x8x8xf32, #tpu.memory_space<vmem>>, vector<1x4x8x8xf32>,
    } else {
    }
    return
  }
  func.func @transform_0(%arg0: i32, %arg1: i32, %arg2: i32, %arg3: memref<2xi32, #tpu.memory_space<smem>>) -> (i32, i32, i32, i32) {
    %c0_i32 = arith.constant 0 : i32
    %c0_i32_0 = arith.constant 0 : i32
    %c0_i32_1 = arith.constant 0 : i32
    return %arg0, %c0_i32, %arg1, %c0_i32_0 : i32, i32, i32, i32
  }
  func.func @transform_1(%arg0: i32, %arg1: i32, %arg2: i32, %arg3: memref<2xi32, #tpu.memory_space<smem>>) -> (i32, i32, i32, i32) {
    %0 = arith.index_cast %arg0 : i32 to index
    %1 = memref.load %arg3[%0] : memref<2xi32, #tpu.memory_space<smem>>
    %c1_i32 = arith.constant 1 : i32
    %2 = arith.subi %1, %c1_i32 : i32
    %3 = arith.minsi %arg2, %2 : i32
    %c0_i32 = arith.constant 0 : i32
    %c0_i32_0 = arith.constant 0 : i32
    %c0_i32_1 = arith.constant 0 : i32
    return %arg0, %c0_i32, %3, %c0_i32_0 : i32, i32, i32, i32
  }
  func.func @transform_2(%arg0: i32, %arg1: i32, %arg2: i32, %arg3: memref<2xi32, #tpu.memory_space<smem>>) -> (i32, i32, i32, i32) {
    %0 = arith.index_cast %arg0 : i32 to index
    %1 = memref.load %arg3[%0] : memref<2xi32, #tpu.memory_space<smem>>
    %c1_i32 = arith.constant 1 : i32
    %2 = arith.subi %1, %c1_i32 : i32
    %3 = arith.minsi %arg2, %2 : i32
    %c0_i32 = arith.constant 0 : i32
    %c0_i32_0 = arith.constant 0 : i32
    %c0_i32_1 = arith.constant 0 : i32
    return %arg0, %c0_i32, %3, %c0_i32_0 : i32, i32, i32, i32
  }
  func.func @transform_3(%arg0: i32, %arg1: i32, %arg2: i32, %arg3: memref<2xi32, #tpu.memory_space<smem>>) -> (i32, i32, i32) {
    %0 = arith.index_cast %arg0 : i32 to index
    %1 = memref.load %arg3[%0] : memref<2xi32, #tpu.memory_space<smem>>
    %c1_i32 = arith.constant 1 : i32
    %2 = arith.subi %1, %c1_i32 : i32
    %3 = arith.minsi %arg2, %2 : i32
    %c0_i32 = arith.constant 0 : i32
    %c0_i32_0 = arith.constant 0 : i32
    return %arg0, %c0_i32, %3 : i32, i32, i32
  }
  func.func @transform_4(%arg0: i32, %arg1: i32, %arg2: i32, %arg3: memref<2xi32, #tpu.memory_space<smem>>) -> (i32, i32, i32, i32) {
    %c0_i32 = arith.constant 0 : i32
    %c0_i32_0 = arith.constant 0 : i32
    %c0_i32_1 = arith.constant 0 : i32
    return %arg0, %c0_i32, %arg1, %c0_i32_0 : i32, i32, i32, i32
  }
}

</mosaic_0001>

<bundles_post_ra>
// kernel: tpu_custom_call.1
= control target key start
LH: loop header
LB: loop body
LE: loop exit
PB: predicated region body
PF: predicated region fallthrough
CT: control target
= control target key end

     0   :  { %s2515_s0 = inlined_call_operand.hbm [shape: s32[2], index: 0, kind: input, shape index: {}]   ;;  %s2516_s1 = inlined_call_operand.hbm [shape: f32[2,4,8,8], index: 1, kind: input, shape index: {}]   ;;  %s2517_s2 = inlined_call_operand.hbm [shape: f32[2,4,8,8], index: 2, kind: input, shape index: {}]   ;;  %s2518_s3 = inlined_call_operand.hbm [shape: f32[2,4,8,8], index: 3, kind: input, shape index: {}]   ;;  %s2519_s4 = inlined_call_operand.vmem [shape: f32[2,1,8], index: 4, kind: input, shape index: {}]   ;;  %s2520_s5 = inlined_call_operand.hbm [shape: f32[2,4,8,8], index: 5, kind: output, shape index: {}]  }
   0x1   :  { %2538 = sst [smem:[#allocation31_spill]] %s2517_s2  ;;  %s1675_s20 = scalar_lea.hbm %s2515_s0, 16 }
   0x2   :  { %2539 = sst [smem:[#allocation32_spill]] %s2519_s4  ;;  %p1676_p0 = scmp.ne.s32.totalorder %s2515_s0, %s1675_s20 }
   0x3   :  { %2540 = sst [smem:[#allocation33_spill]] %s2520_s5  ;;  %p1679_p1 = scmp.lt.u32.totalorder %s1675_s20, %s2515_s0 }
   0x5   :  { %p1681_p2 = pnand %p1679_p1, %p1676_p0 }
   0x7   :  { %1684 = shalt.err (!%p1681_p2)  }
   0x8   :  { %s1917_s25 = smov [#allocation6]  }
   0x9   :  { %11 = dma.hbm_to_smem %s2515_s0, 16, %s1917_s25, [#allocation5] }
   0xa   :  { %1851 = dma.done.wait [#allocation5], 16 }
   0xb   :  { %1852 = vsyncadd [#allocation5], 4294967280 }
   0xc   :  { %13 = sfence }
   0xd   :  { %14 = vsyncpa [#allocation8], 0 }
   0xe   :  { %16 = vsyncpa [#allocation8 + $0x1], 0 }
   0xf   :  { %17 = vsyncpa [#allocation11], 0 }
  0x10   :  { %19 = vsyncpa [#allocation11 + $0x1], 0 }
  0x11   :  { %20 = vsyncpa [#allocation9], 0 }
  0x12   :  { %22 = vsyncpa [#allocation9 + $0x1], 0  ;;  %s1974_s28 = smov 0   ;;  %s1976_s29 = smov 0  }
  0x13   :  { %s1978_s30 = smov 0   ;;  %s1980_s6 = smov 0  }
  0x14   :  { %s1982_s7 = smov 0   ;;  %s1984_s0 = smov 0  }
  0x15   :  { %s1986_s8 = smov 0   ;;  %s1988_s9 = smov 0  }
  0x16   :  { %s1990_s10 = smov 0   ;;  %s1992_s11 = smov 0  }
  0x17   :  { %s1994_s12 = smov 0   ;;  %s1996_s13 = smov 0  }
  0x18 LB: > { %2541 = sst [smem:[#allocation23_spill]] %s1891_s0  ;;  %s2033_s14 = sadd.s32 4294967295, %s1915_s13   ;;  %s1915_s13 = sphi %s1996_s13, %s28_s13   ;;  %s1911_s12 = sphi %s1994_s12, %s2588_s12   ;;  %s1907_s11 = sphi %s1992_s11, %s2587_s11   ;;  %s1903_s10 = sphi %s1990_s10, %s2586_s10   ;;  %s1899_s9 = sphi %s1988_s9, %s2595_s9   ;;  %s1895_s8 = sphi %s1986_s8, %s2594_s8   ;;  %s1891_s0 = sphi %s1984_s0, %s2584_s0   ;;  %s1887_s7 = sphi %s1982_s7, %s2593_s7   ;;  %s1883_s6 = sphi %s1980_s6, %s2592_s6   ;;  %s1879_s30 = sphi %s1978_s30, %s2591_s30   ;;  %s1875_s29 = sphi %s1976_s29, %s2590_s29   ;;  %s1871_s28 = sphi %s1974_s28, %s2589_s28  }
  0x19   : > { %2542 = sst [smem:[#allocation24_spill]] %s1903_s10  ;;  %s47_s15 = sadd.s32 1, %s1911_s12 }
  0x1a   : > { %2543 = sst [smem:[#allocation25_spill]] %s1907_s11  ;;  %p49_p3 = scmp.ge.s32.totalorder %s47_s15, 2 }
  0x1b   : > { %2544 = sst [smem:[#allocation26_spill]] %s1911_s12  ;;  %p2527_p4 = scmp.eq.s32.totalorder %s1915_s13, 0 }
  0x1c   : > { %p2526_p5 = scmp.eq.s32.totalorder %s2033_s14, 0  ;;  %s79_s16 = sld [smem:[#allocation6 + %s1911_s12]] }
  0x1d   : > { %s2597_s15 = smov (%p49_p3, %s47_s15), 0  ;;  %p99_p6 = scmp.ne.s32.totalorder %s1891_s0, %s1887_s7 }
  0x1e   : > { %2545 = sst [smem:[#allocation27_spill]] %s2597_s15  ;;  %s2046_s18 = ssub.s32 %s1911_s12, %s2597_s15 }
  0x1f   : > { %s83_s19 = sld [smem:[#allocation6 + %s2597_s15]]  ;;  %p2051_p7 = por %p99_p6, %p2527_p4 }
  0x20   : > { %p105_p8 = scmp.ne.s32.totalorder %s1887_s7, %s1883_s6  ;;  %s115_s21 = sld [smem:[#allocation6 + %s1911_s12]] }
  0x21   : > { %s119_s22 = sld [smem:[#allocation6 + %s2597_s15]]  ;;  %s128_s25 = sadd.s32 1, %s1879_s30 }
  0x22   : > { %s1393_s23 = sadd.s32 4294967295, %s79_s16  ;;  %p2060_p9 = por %p105_p8, %p2526_p5 }
  0x23   : > { %p1394_p10 = scmp.gt.s32.totalorder %s1393_s23, 0  ;;  %p135_p11 = scmp.ne.s32.totalorder %s1879_s30, %s1875_s29 }
  0x24   : > { %s2547_s24 = scalar_select %p2060_p9, 1, 0 }
  0x25   : > { %p141_p12 = scmp.ne.s32.totalorder %s1875_s29, %s1871_s28  ;;  %s2599_s23 = smov (%p1394_p10, %s1393_s23), 0 }
  0x26   : > { %s1395_s26 = sadd.s32 4294967295, %s83_s19  ;;  %p2071_p13 = por %p135_p11, %p2527_p4 }
  0x27   : > { %p1396_p0 = scmp.gt.s32.totalorder %s1395_s26, 0  ;;  %s1397_s6 = sadd.s32 4294967295, %s115_s21 }
  0x28   : > { %p1398_p1 = scmp.gt.s32.totalorder %s1397_s6, 0  ;;  %s1399_s16 = sadd.s32 4294967295, %s119_s22 }
  0x29   : > { %s2601_s26 = smov (%p1396_p0, %s1395_s26), 0  ;;  %p1400_p2 = scmp.gt.s32.totalorder %s1399_s16, 0 }
  0x2a   : > { %s2603_s6 = smov (%p1398_p1, %s1397_s6), 0  ;;  %s88_s17 = ssub.s32 %s2599_s23, %s2601_s26 }
  0x2b   : > { %s89_s19 = sor.u32 %s88_s17, %s2046_s18  ;;  %p2081_p3 = por %p141_p12, %p2526_p5 }
  0x2c   : > { %p90_p6 = scmp.eq.s32.totalorder %s89_s19, 0  ;;  %s2605_s16 = smov (%p1400_p2, %s1399_s16), 0 }
  0x2d   : > { %s2549_s15 = scalar_select %p2081_p3, 1, 0 }
  0x2e   : > { %s2550_s21 = sadd.s32 1, %s1891_s0  ;;  %s124_s23 = ssub.s32 %s2603_s6, %s2605_s16 }
  0x2f   : > { %s2089_s22 = scalar_select %p90_p6, %s1891_s0, %s2550_s21  }
  0x30   : > { %p2525_p10 = scmp.lt.s32.totalorder %s1915_s13, 2  ;;  %s125_s17 = sor.u32 %s124_s23, %s2046_s18 }
  0x31   : > { %2551 = sst [smem:[#allocation28_spill]] %s2089_s22  ;;  %p126_p11 = scmp.eq.s32.totalorder %s125_s17, 0 }
  0x32   : > { %s251_s28 = sand.u32 1, %s1915_s13   ;;  %s253_s26 = sand.u32 1, %s1891_s0  }
  0x33   : > { %s2096_s19 = scalar_select %p126_p11, %s1879_s30, %s128_s25  }
  0x34   : > { %s1410_s5 = sshll.u32 %s253_s26, 5  ;;  %p2112_p12 = pnand %p2525_p10, %p2051_p7 }
  0x35   : > { %2552 = sst [smem:[#allocation29_spill]] %s2096_s19  ;;  %s255_s16 = scalar_lea.vmem [#allocation10], %s1410_s5 }
  0x36   : > { %s1509_s21 = scalar_select %p2051_p7, [#allocation6], [#allocation14] }
  0x37   : > { %s1510_s6 = scalar_select %p2051_p7, %s1911_s12, 0 }
  0x38   : > { %s2607_s21 = smov (!%p2525_p10, %s1509_s21), [#allocation16]  ;;  %s267_s23 = sshll.u32 %s255_s16, 4  ;;  %s2116_s23 = int_to_ptr.vmem [resolvable:$true] %s267_s23 }
  0x39   : > { %s2609_s6 = smov (!%p2525_p10, %s1510_s6), 0  ;;  %p1420_p0 = scmp.ge.s32.totalorder %s1915_s13, 1 }
  0x3a   : > { %s256_s17 = sld [smem:[%s2607_s21 + %s2609_s6]]  ;;  %p318_p1 = scmp.lt.s32.totalorder %s1915_s13, 3 }
  0x3b   : > { %s1512_s26 = scalar_select %p2071_p13, [#allocation6], [#allocation15] }
  0x3c   : > { %s1513_s4 = scalar_select %p2071_p13, %s1911_s12, 0 }
  0x3d   : > { %s2611_s26 = smov (!%p2525_p10, %s1512_s26), [#allocation17]  ;;  %p2131_p2 = pnand %p1420_p0, %p318_p1 }
  0x3e   : > { %s2613_s4 = smov (!%p2525_p10, %s1513_s4), 0  ;;  %s2555_s6 = sshll.u32 %s1911_s12, 2 }
  0x3f   : > { %s2129_s20 = sld [smem:[%s2611_s26 + %s2613_s4]]  ;;  %p1687_p11 = pneg %p2112_p12 }
  0x40   : > { %s1411_s5 = sadd.s32 4294967295, %s256_s17  ;;  %s2556_s2 = sld [smem:[#allocation31_spill]] }
  0x41   : > { %p1412_p7 = scmp.gt.s32.totalorder %s1411_s5, 0  ;;  %s2143_s17 = scalar_lea.sflag [#allocation11], %s251_s28 }
  0x42   : > { %s2554_s21 = scalar_select %p2131_p2, 1, 0 }
  0x43   : > { %s2615_s5 = smov (%p1412_p7, %s1411_s5), 0 }
  0x44   : > { %s264_s16 = sadd.s32 %s2555_s6, %s2615_s5 }
  0x45   : > { %s1414_s22 = sshll.u32 %s264_s16, 7  ;;  %s1416_s4 = sadd.s32 4294967295, %s2129_s20 }
  0x46   : > { %s2140_s11 = scalar_lea.hbm %s2556_s2, %s1414_s22  ;;  %s1690_s0 = scalar_lea.hbm %s2556_s2, 1024 }
  0x47   : > { %s1685_s26 = scalar_lea.hbm %s2140_s11, 512  ;;  %p1691_p7 = scmp.lt.u32.totalorder %s2140_s11, %s2556_s2 }
  0x48   : > { %p1686_p6 = scmp.ne.s32.totalorder %s2140_s11, %s1685_s26  ;;  %p1692_p8 = scmp.lt.u32.totalorder %s1690_s0, %s1685_s26 }
  0x49   : > { %p1694_p5 = scmp.lt.u32.totalorder %s1685_s26, %s2140_s11 }
  0x4a   : > { %p1688_p0 = pnand %p1687_p11, %p1686_p6  ;;  %p1693_p10 = por %p1692_p8, %p1691_p7 }
  0x4c   : > { %p1689_p1 = pneg %p1688_p0  ;;  %p1695_p4 = por %p1694_p5, %p1693_p10 }
  0x4e   : > { %p1696_p3 = pnand %p1695_p4, %p1689_p1 }
  0x50   : > { %1699 = shalt.err (!%p1696_p3)
}
  0x51   : > { %s1700_s28 = scalar_lea.vmem %s2116_s23, 512  ;;  %s1918_s16 = smov [#allocation10]  }
  0x52   : > { %p1701_p6 = scmp.ne.s32.totalorder %s2116_s23, %s1700_s28  ;;  %s1705_s5 = sshll.u32 %s1918_s16, 4  ;;  %s1706_s5 = int_to_ptr.vmem [resolvable:$false] %s1705_s5 }
  0x53   : > { %s1707_s6 = scalar_lea.vmem %s1706_s5, 1024  ;;  %p1708_p2 = scmp.lt.s32.totalorder %s2116_s23, %s1706_s5 }
  0x54   : > { %p1703_p0 = pnand %p1701_p6, %p1687_p11  ;;  %p1709_p8 = scmp.lt.s32.totalorder %s1707_s6, %s1700_s28 }
  0x56   : > { %p1704_p9 = pneg %p1703_p0  ;;  %p1710_p7 = por %p1709_p8, %p1708_p2 }
  0x58   : > { %p1711_p5 = pnand %p1710_p7, %p1704_p9 }
  0x5a   : > { %1714 = shalt.err (!%p1711_p5)
}
  0x5b   : > { %s2530_s26 = smov 128   ;;  %s2532_s0 = smov 8  }
  0x5c   : > { %1528 = dma.hbm_to_vmem [thread:$0]  (!%p2112_p12), %s2140_s11, 512, %s2116_s23, %s2143_s17, %s2530_s26, %s2530_s26, %s2532_s0  }
  0x5d   : > { %p1417_p4 = scmp.gt.s32.totalorder %s1416_s4, 0  ;;  %s1392_s22 = sadd.s32 4294967294, %s1915_s13  }
  0x5e   : > { %p54_p9 = scmp.eq.s32.totalorder %s2046_s18, 0  ;;  %s2557_s19 = sshll.u32 %s1911_s12, 2 }
  0x5f   : > { %s2617_s4 = smov (%p1417_p4, %s1416_s4), 0  ;;  %s56_s16 = sadd.s32 1, %s1903_s10 }
  0x60   : > { %s290_s28 = sadd.s32 %s2557_s19, %s2617_s4  ;;  %p63_p3 = scmp.ne.s32.totalorder %s1903_s10, %s1899_s9 }
  0x61   : > { %s1419_s5 = sshll.u32 %s290_s28, 7  ;;  %p69_p10 = scmp.ne.s32.totalorder %s1899_s9, %s1895_s8 }
  0x62   : > { %s2188_s25 = scalar_lea.hbm %s2518_s3, %s1419_s5  ;;  %p2559_p12 = scmp.eq.s32.totalorder %s1915_s13, 0 }
  0x63   : > { %s2193_s11 = scalar_select %p54_p9, %s1903_s10, %s56_s16  }
  0x64   : > { %p65_p2 = por %p2559_p12, %p63_p3  ;;  %p2560_p11 = scmp.eq.s32.totalorder %s2033_s14, 0 }
  0x65   : > { %2558 = sst [smem:[#allocation30_spill]] %s2193_s11  ;;  %p203_p6 = scmp.eq.s32.totalorder %s2033_s14, 1 }
  0x66   : > { %p2199_p1 = por %p2560_p11, %p69_p10  ;;  %p209_p0 = scmp.eq.s32.totalorder %s1392_s22, 1 }
  0x67   : > { %s229_s23 = sand.u32 1, %s1903_s10   ;;  %s1450_s20 = sshll.u32 %s1911_s12, 9 }
  0x68   : > { %s2561_s18 = scalar_select %p2199_p1, 1, 0 }
  0x69   : > { %p2206_p8 = por %p203_p6, %p63_p3  ;;  %p2210_p7 = por %p209_p0, %p69_p10 }
  0x6a   : > { %s1407_s19 = sshll.u32 %s229_s23, 5  ;;  %s2217_s5 = scalar_lea.hbm %s2516_s1, %s1450_s20 }
  0x6b   : > { %s2562_s2 = scalar_select %p2206_p8, 1, 0 }
  0x6c   : > { %s2563_s4 = scalar_select %p2210_p7, 1, 0 }
  0x6d   : > { %s233_s22 = scalar_lea.vmem [#allocation7], %s1407_s19  ;;  %p2564_p5 = scmp.lt.s32.totalorder %s1915_s13, 2 }
  0x6e   : > { %s241_s6 = sshll.u32 %s233_s22, 4  ;;  %s279_s0 = sand.u32 1, %s1879_s30   ;;  %s2225_s6 = int_to_ptr.vmem [resolvable:$true] %s241_s6 }
  0x6f   : > { %p2221_p4 = pnand %p2564_p5, %p65_p2  ;;  %s2228_s12 = sshll.u32 %s279_s0, 5 }
  0x70   : > { %s2230_s20 = scalar_lea.sflag [#allocation8], %s229_s23  ;;  %s1715_s28 = scalar_lea.hbm %s2217_s5, 512 }
  0x71   : > { %p1716_p9 = scmp.ne.s32.totalorder %s2217_s5, %s1715_s28  ;;  %p1717_p3 = pneg %p2221_p4 }
  0x72   : > { %s1720_s22 = scalar_lea.hbm %s2516_s1, 1024  ;;  %p1721_p2 = scmp.lt.u32.totalorder %s2217_s5, %s2516_s1 }
  0x73   : > { %p1718_p10 = pnand %p1717_p3, %p1716_p9  ;;  %p1722_p11 = scmp.lt.u32.totalorder %s1720_s22, %s1715_s28 }
  0x74   : > { %p1724_p0 = scmp.lt.u32.totalorder %s1715_s28, %s2217_s5 }
  0x75   : > { %p1719_p12 = pneg %p1718_p10  ;;  %p1723_p6 = por %p1722_p11, %p1721_p2 }
  0x77   : > { %p1725_p5 = por %p1724_p0, %p1723_p6 }
  0x79   : > { %p1726_p7 = pnand %p1725_p5, %p1719_p12 }
  0x7b   : > { %1729 = shalt.err (!%p1726_p7)
}
  0x7c   : > { %s1730_s0 = scalar_lea.vmem %s2225_s6, 512  ;;  %s1921_s23 = smov [#allocation7]  }
  0x7d   : > { %p1731_p9 = scmp.ne.s32.totalorder %s2225_s6, %s1730_s0  ;;  %s1735_s19 = sshll.u32 %s1921_s23, 4  ;;  %s1736_s19 = int_to_ptr.vmem [resolvable:$false] %s1735_s19 }
  0x7e   : > { %s1737_s10 = scalar_lea.vmem %s1736_s19, 1024  ;;  %p1738_p1 = scmp.lt.s32.totalorder %s2225_s6, %s1736_s19 }
  0x7f   : > { %p1733_p10 = pnand %p1731_p9, %p1717_p3  ;;  %p1739_p2 = scmp.lt.s32.totalorder %s1737_s10, %s1730_s0 }
  0x81   : > { %p1734_p8 = pneg %p1733_p10  ;;  %p1740_p11 = por %p1739_p2, %p1738_p1 }
  0x83   : > { %p1741_p6 = pnand %p1740_p11, %p1734_p8 }
  0x85   : > { %1744 = shalt.err (!%p1741_p6)
}
  0x86   : > { %s2566_s11 = smov 8   ;;  %s2567_s28 = smov 128  }
  0x87   : > { %1523 = dma.hbm_to_vmem [thread:$0]  (!%p2221_p4), %s2217_s5, 512, %s2225_s6, %s2230_s20, %s2567_s28, %s2567_s28, %s2566_s11  }
  0x88   : > { %p2568_p1 = scmp.lt.s32.totalorder %s1915_s13, 2  ;;  %s281_s26 = scalar_lea.vmem [#allocation12], %s2228_s12 }
  0x89   : > { %s293_s22 = sshll.u32 %s281_s26, 4  ;;  %s1745_s0 = scalar_lea.hbm %s2188_s25, 512  ;;  %s2270_s22 = int_to_ptr.vmem [resolvable:$true] %s293_s22 }
  0x8a   : > { %p2265_p8 = pnand %p2568_p1, %p2071_p13  ;;  %p1746_p7 = scmp.ne.s32.totalorder %s2188_s25, %s1745_s0 }
  0x8b   : > { %s1750_s6 = scalar_lea.hbm %s2518_s3, 1024  ;;  %p1751_p13 = scmp.lt.u32.totalorder %s2188_s25, %s2518_s3 }
  0x8c   : > { %p1747_p3 = pneg %p2265_p8  ;;  %p1752_p0 = scmp.lt.u32.totalorder %s1750_s6, %s1745_s0 }
  0x8d   : > { %p1754_p9 = scmp.lt.u32.totalorder %s1745_s0, %s2188_s25 }
  0x8e   : > { %p1748_p12 = pnand %p1747_p3, %p1746_p7  ;;  %p1753_p5 = por %p1752_p0, %p1751_p13 }
  0x90   : > { %p1749_p4 = pneg %p1748_p12  ;;  %p1755_p10 = por %p1754_p9, %p1753_p5 }
  0x92   : > { %p1756_p2 = pnand %p1755_p10, %p1749_p4 }
  0x94   : > { %1759 = shalt.err (!%p1756_p2)
}
  0x95   : > { %s1760_s12 = scalar_lea.vmem %s2270_s22, 512  ;;  %s1922_s19 = smov [#allocation12]  }
  0x96   : > { %p1761_p11 = scmp.ne.s32.totalorder %s2270_s22, %s1760_s12  ;;  %s1765_s10 = sshll.u32 %s1922_s19, 4  ;;  %s1766_s10 = int_to_ptr.vmem [resolvable:$false] %s1765_s10 }
  0x97   : > { %s1767_s26 = scalar_lea.vmem %s1766_s10, 1024  ;;  %p1768_p7 = scmp.lt.s32.totalorder %s2270_s22, %s1766_s10 }
  0x98   : > { %p1763_p6 = pnand %p1761_p11, %p1747_p3  ;;  %p1769_p12 = scmp.lt.s32.totalorder %s1767_s26, %s1760_s12 }
  0x9a   : > { %p1764_p1 = pneg %p1763_p6  ;;  %p1770_p13 = por %p1769_p12, %p1768_p7 }
  0x9c   : > { %p1771_p0 = pnand %p1770_p13, %p1764_p1 }
  0x9e   : > { %1774 = shalt.err (!%p1771_p0)
}
  0x9f   : > { %1533 = dma.hbm_to_vmem [thread:$0]  (!%p2265_p8), %s2188_s25, 512, %s2270_s22, %s2143_s17, %s2567_s28, %s2567_s28, %s2566_s11  }
  0xa0   : > { %p2570_p3 = scmp.ne.s32.totalorder %s2554_s21, 0 }
  0xa1   : > { %s2304_s0 = sand.u32 (!%p2570_p3), 1, %s1899_s9   ;;  %p2571_p4 = scmp.ne.s32.totalorder (!%p2570_p3), %s2561_s18, 0 }
  0xa2   : > { %322 = sbr.rel (%p2570_p3) target bundleno = 1091 (0x443), region = 36  ;;  %s1421_s27 = sshll.u32 (!%p2570_p3), %s2304_s0, 5 }
  0xa3   : > { %s325_s5 = scalar_lea.sflag (!%p2570_p3), [#allocation8], %s2304_s0  ;;  %s2310_s16 = scalar_lea.vmem (!%p2570_p3), [#allocation7], %s1421_s27 }
  0xa9   : > { %1854 = dma.done.wait (%p2571_p4), %s325_s5, 512  }
  0xaa   : > { %1856 = vsyncadd (%p2571_p4), %s325_s5, 4294966784  ;;  %s333_s21 = sand.u32 1, %s2033_s14   ;;  %s335_s17 = sand.u32 1, %s1887_s7  }
  0xab   : > { %s1422_s25 = sshll.u32 %s335_s17, 5  ;;  %s334_s11 = scalar_lea.sflag [#allocation11], %s333_s21 }
  0xac   : > { %s2318_s28 = scalar_lea.vmem [#allocation10], %s1422_s25  ;;  %p2572_p8 = scmp.ne.s32.totalorder %s2547_s24, 0 }
  0xae   : > { %1858 = dma.done.wait (%p2572_p8), %s334_s11, 512  }
  0xaf   : > { %1860 = vsyncadd (%p2572_p8), %s334_s11, 4294966784  ;;  %s344_s22 = sand.u32 1, %s1875_s29   ;;  %p2573_p5 = scmp.ne.s32.totalorder %s2549_s15, 0 }
  0xb0   : > { %s1423_s6 = sshll.u32 %s344_s22, 5 }
  0xb1   : > { %s2325_s18 = scalar_lea.vmem [#allocation12], %s1423_s6 }
  0xb2   : > { %1862 = dma.done.wait (%p2573_p5), %s334_s11, 512  }
  0xb3   : > { %1864 = vsyncadd (%p2573_p5), %s334_s11, 4294966784  ;;  %s2574_s14 = sld [smem:[#allocation25_spill]]  ;;  %vm417_vm0 = vcmask 7168   ;;  %v1923_v0 = vmov -inf   ;;  %v1924_v1 = vmov 0.0   ;;  %vm426_vm1 = vcmask 64512  }
  0xb4   : > { %418 = vst.msk [vmem:[#allocation2] sm:$0xff] %vm417_vm0, %v1923_v0  ;;  %419 = vst.msk [vmem:[#allocation2 + $0x8] sm:$0xff] %vm417_vm0, %v1923_v0  ;;  %s2575_s10 = sld [smem:[#allocation32_spill]]  ;;  %s2354_s5 = scalar_lea.vmem [#allocation13], %s1421_s27 }
  0xb5   : > { %420 = vst.msk [vmem:[#allocation2 + $0x10] sm:$0xff] %vm417_vm0, %v1923_v0  ;;  %421 = vst.msk [vmem:[#allocation2 + $0x18] sm:$0xff] %vm417_vm0, %v1923_v0 }
  0xb6   : > { %422 = vst.msk [vmem:[#allocation3] sm:$0xff] %vm417_vm0, %v1924_v1  ;;  %423 = vst.msk [vmem:[#allocation3 + $0x8] sm:$0xff] %vm417_vm0, %v1924_v1 }
  0xb7   : > { %424 = vst.msk [vmem:[#allocation3 + $0x10] sm:$0xff] %vm417_vm0, %v1924_v1  ;;  %425 = vst.msk [vmem:[#allocation3 + $0x18] sm:$0xff] %vm417_vm0, %v1924_v1 }
  0xb8   : > { %427 = vst.msk [vmem:[#allocation4] sm:$0xff] %vm426_vm1, %v1924_v1  ;;  %428 = vst.msk [vmem:[#allocation4 + $0x8] sm:$0xff] %vm426_vm1, %v1924_v1 }
  0xb9   : > { %s399_s20 = sld [smem:[#allocation6 + %s2574_s14]]  ;;  %429 = vst.msk [vmem:[#allocation4 + $0x10] sm:$0xff] %vm426_vm1, %v1924_v1  ;;  %430 = vst.msk [vmem:[#allocation4 + $0x18] sm:$0xff] %vm426_vm1, %v1924_v1  ;;  %p403_p9 = scmp.lt.s32.totalorder %s2574_s14, 1 }
  0xba   : > { %s431_s23 = sld [smem:[#allocation6 + %s2574_s14]] }
  0xbb   : > { %s2619_s14 = smov (!%p403_p9, %s2574_s14), 1 }
  0xbf   : > { %s1425_s15 = sadd.s32 4294967295, %s399_s20 }
  0xc0   : > { %p1426_p10 = scmp.gt.s32.totalorder %s1425_s15, 0  ;;  %p1428_p2 = scmp.lt.s32.totalorder %s1425_s15, 0 }
  0xc1   : > { %p1431_p11 = scmp.le.s32.totalorder %s431_s23, 0 }
  0xc2   : > { %s2621_s15 = smov (%p1426_p10, %s1425_s15), 0  ;;  %v440_v2 = vld [vmem:[%s2318_s28] sm:$0xff] (!%p1431_p11)  ;;  %v441_v3 = vld [vmem:[%s2318_s28 + $0x8] sm:$0xff] (!%p1431_p11)  ;;  %v1925_v4 = vmov (!%p1431_p11), 0.0   ;;  %vm1926_vm2 = vmmov (!%p1431_p11), 0   ;;  %v442_v7 = vld [vmem:[%s2318_s28 + $0x10] sm:$0xff] (!%p1431_p11) }
  0xc3   : > { %s2623_s15 = smov (!%p1428_p2, %s2621_s15), 0  ;;  %435 = sbr.rel (%p1431_p11) target bundleno = 929 (0x3a1), region = 56 }
  0xc4   : > { %s407_s24 = sadd.s32 %s2623_s15, %s2619_s14  ;;  %1468 = vmatprep.subr.mxu0 (!%p1431_p11), %v1925_v4  ;;  %1470 = vmatprep.mubr.msk.f32.mxu0 (!%p1431_p11), %vm1926_vm2, %v1925_v4  ;;  %v436_v5 = vld [vmem:[%s2310_s16] sm:$0xff] (!%p1431_p11)  ;;  %v437_v6 = vld [vmem:[%s2310_s16 + $0x8] sm:$0xff] (!%p1431_p11)  ;;  %v443_v8 = vld [vmem:[%s2318_s28 + $0x18] sm:$0xff] (!%p1431_p11)  ;;  %v1927_v28 = vmov (!%p1431_p11), 0  }
  0xc5   : > { %s2350_s26 = scalar_lea.vmem %s2575_s10, %s407_s24  ;;  %1469 = vmatpush3.xpose.msk.msra.mxu0 (!%p1431_p11), %vm426_vm1, %v440_v2  ;;  %1473 = vmatprep.subr.mxu1 (!%p1431_p11), %v1925_v4  ;;  %v438_v9 = vld [vmem:[%s2310_s16 + $0x10] sm:$0xff] (!%p1431_p11)  ;;  %v439_v10 = vld [vmem:[%s2310_s16 + $0x18] sm:$0xff] (!%p1431_p11)  ;;  %v760_v29 = vld [vmem:[#allocation2] sm:$0xff] (!%p1431_p11) }
  0xc6   : > { %1474 = vmatpush3.xpose.msk.msra.mxu1 (!%p1431_p11), %vm426_vm1, %v441_v3  ;;  %1475 = vmatprep.mubr.msk.f32.mxu1 (!%p1431_p11), %vm1926_vm2, %v1925_v4  ;;  %v1432_v11 = vld [vmem:[%s2350_s26] ss:$0 sm:$0xff] (!%p1431_p11)  ;;  %v2395_v32 = vld [vmem:[#allocation2 + $0x8] sm:$0xff] (!%p1431_p11)  ;;  %v762_v33 = vld [vmem:[#allocation2 + $0x10] sm:$0xff] (!%p1431_p11) }
  0xc7   : > { %1478 = vmatprep.subr.mxu0 (!%p1431_p11), %v1925_v4  ;;  %1483 = vmatprep.subr.mxu1 (!%p1431_p11), %v1925_v4  ;;  %v2399_v40 = vld [vmem:[#allocation2 + $0x18] sm:$0xff] (!%p1431_p11)  ;;  %v444_v46 = vld [vmem:[%s2325_s18] sm:$0xff] (!%p1431_p11)  ;;  %v445_v48 = vld [vmem:[%s2325_s18 + $0x8] sm:$0xff] (!%p1431_p11) }
  0xc8   : > { %1471 = vmatmul.mubr.msk.f32.vlgmr.msra.gmra.mrb[0].mxu0 (!%p1431_p11), %vm426_vm1, %v436_v5  ;;  %1647 = vset.pattern.permute.xlu0 (!%p1431_p11), %v1927_v28  ;;  %v446_v60 = vld [vmem:[%s2325_s18 + $0x10] sm:$0xff] (!%p1431_p11)  ;;  %v447_v0 = vld [vmem:[%s2325_s18 + $0x18] sm:$0xff] (!%p1431_p11) }
  0xc9   : > { %1476 = vmatmul.mubr.msk.f32.vlgmr.msra.gmra.mrb[0].mxu1 (!%p1431_p11), %vm426_vm1, %v437_v6  ;;  %1479 = vmatpush3.xpose.msk.msra.mxu0 (!%p1431_p11), %vm426_vm1, %v442_v7 }
  0xca   : > { %1480 = vmatprep.mubr.msk.f32.mxu0 %vm1926_vm2, %v1925_v4  ;;  %1484 = vmatpush3.xpose.msk.msra.mxu1 %vm426_vm1, %v443_v8 }
  0xcb   : > { %1485 = vmatprep.mubr.msk.f32.mxu1 %vm1926_vm2, %v1925_v4  ;;  %1488 = vmatprep.subr.mxu0 %v1925_v4 }
  0xcc   : > { %1481 = vmatmul.mubr.msk.f32.vlgmr.msra.gmra.mrb[2].mxu0 %vm426_vm1, %v438_v9  ;;  %1493 = vmatprep.subr.mxu1 %v1925_v4 }
  0xcd   : > { %1486 = vmatmul.mubr.msk.f32.vlgmr.msra.gmra.mrb[2].mxu1 %vm426_vm1, %v439_v10  ;;  %1490 = vmatprep.mubr.msk.f32.mxu0 %vm1926_vm2, %v1925_v4 }
  0xce   : > { %1495 = vmatprep.mubr.msk.f32.mxu1 %vm1926_vm2, %v1925_v4  ;;  %1648 = vset.pattern.permute.xlu1 %v1927_v28 }
  0xcf   : > { %1489 = vmatpush3.msra.mxu0 %v444_v46  ;;  %1494 = vmatpush3.msra.mxu1 %v445_v48 }
  0xd0   : > { %1498 = vmatprep.subr.mxu0 %v1925_v4  ;;  %1503 = vmatprep.subr.mxu1 %v1925_v4 }
 0x19b   : > { %v528_v12 = vpop.f32.mrb[0].mxu0 }
 0x19c   : > { %v529_v13 = vadd.f32 %v1432_v11, %v528_v12  ;;  %v1472_v14 = vpop.f32.mrb[1].mxu0  ;;  %v604_v15 = vpop.f32.mrb[0].mxu1 }
 0x19d   : > { %v605_v16 = vadd.f32 %v1432_v11, %v604_v15  ;;  %v1477_v17 = vpop.f32.mrb[1].mxu1  ;;  %v824_v14 = vld [vmem:[#allocation3] sm:$0xff] }
 0x19e   : > { %v764_v18 = vsel %vm426_vm1, %v529_v13, -inf  ;;  %v825_v17 = vld [vmem:[#allocation3 + $0x8] sm:$0xff] }
 0x19f   : > { %765 = vmax.xlane.f32.xlu0 %v764_v18  ;;  %v680_v19 = vpop.f32.mrb[2].mxu0  ;;  %v767_v21 = vsel %vm426_vm1, %v605_v16, -inf }
 0x1a0   : > { %v681_v20 = vadd.f32 %v1432_v11, %v680_v19  ;;  %v1482_v22 = vpop.f32.mrb[3].mxu0  ;;  %v756_v23 = vpop.f32.mrb[2].mxu1 }
 0x1a1   : > { %v757_v24 = vadd.f32 %v1432_v11, %v756_v23  ;;  %v1487_v25 = vpop.f32.mrb[3].mxu1  ;;  %v826_v23 = vld [vmem:[#allocation3 + $0x10] sm:$0xff] }
 0x1a2   : > { %v770_v26 = vsel %vm426_vm1, %v681_v20, -inf }
 0x1a3   : > { %768 = vmax.xlane.f32.xlu0 %v767_v21  ;;  %771 = vmax.xlane.f32.xlu1 %v770_v26  ;;  %v773_v27 = vsel %vm426_vm1, %v757_v24, -inf  ;;  %v827_v26 = vld [vmem:[#allocation3 + $0x18] sm:$0xff] }
 0x1a7   : > { %774 = vmax.xlane.f32.xlu1 %v773_v27 }
 0x22c   : > { %v766_v30 = vpop.xlane.xlu0 %765 }
 0x22d   : > { %v776_v31 = vmax.f32 %v760_v29, %v766_v30 }
 0x22f   : > { %v780_v34 = vsub.f32 %v760_v29, %v776_v31  ;;  %1181 = vst.msk [vmem:[#allocation2] sm:$0xff] %vm417_vm0, %v776_v31  ;;  %794 = vperm.xlu0 %1647, %v776_v31   ;;  %v853_v31 = vld [vmem:[#allocation4] sm:$0xff] }
 0x230   : > { %v769_v35 = vpop.xlane.xlu0 %768  ;;  %v772_v36 = vpop.xlane.xlu1 %771 }
 0x231   : > { %v784_v37 = vmul.f32 1.442695, %v780_v34  ;;  %v777_v38 = vmax.f32 %v2395_v32, %v769_v35  ;;  %v778_v39 = vmax.f32 %v762_v33, %v772_v36 }
 0x233   : > { %1649 = vpow2.f32 %v784_v37  ;;  %v781_v41 = vsub.f32 %v2395_v32, %v777_v38  ;;  %1182 = vst.msk [vmem:[#allocation2 + $0x8] sm:$0xff] %vm417_vm0, %v777_v38  ;;  %799 = vperm.xlu1 %1648, %v777_v38   ;;  %v782_v42 = vsub.f32 %v762_v33, %v778_v39  ;;  %1183 = vst.msk [vmem:[#allocation2 + $0x10] sm:$0xff] %vm417_vm0, %v778_v39  ;;  %v854_v33 = vld [vmem:[#allocation4 + $0x8] sm:$0xff] }
 0x234   : > { %v775_v43 = vpop.xlane.xlu1 %774 }
 0x235   : > { %v779_v44 = vmax.f32 %v2399_v40, %v775_v43  ;;  %v788_v2 = vmul.f32 1.442695, %v782_v42  ;;  %v786_v7 = vmul.f32 1.442695, %v781_v41 }
 0x237   : > { %804 = vperm.xlu1 %1648, %v778_v39   ;;  %v783_v45 = vsub.f32 %v2399_v40, %v779_v44  ;;  %1184 = vst.msk [vmem:[#allocation2 + $0x18] sm:$0xff] %vm417_vm0, %v779_v44  ;;  %v855_v39 = vld [vmem:[#allocation4 + $0x10] sm:$0xff] }
 0x23b   : > { %809 = vperm.xlu1 %1648, %v779_v44   ;;  %v856_v44 = vld [vmem:[#allocation4 + $0x18] sm:$0xff] }
 0x23d   : > { %v1650_v47 = vpop.eup %1649 }
 0x23e   : > { %v828_v15 = vmul.f32 %v1650_v47, %v824_v14 }
 0x23f   : > { %859 = vperm.xlu1 %1648, %v1650_v47  }
 0x2ae   : > { %v795_v49 = vpop.permute.xlu0 %794 }
 0x2af   : > { %v812_v50 = vsub.f32 %v529_v13, %v795_v49 }
 0x2b1   : > { %v816_v51 = vmul.f32 1.442695, %v812_v50 }
 0x2b2   : > { %v800_v52 = vpop.permute.xlu1 %799 }
 0x2b3   : > { %1651 = vpow2.f32 %v816_v51  ;;  %v813_v53 = vsub.f32 %v605_v16, %v800_v52 }
 0x2b5   : > { %v818_v54 = vmul.f32 1.442695, %v813_v53 }
 0x2b6   : > { %v805_v55 = vpop.permute.xlu1 %804 }
 0x2b7   : > { %1653 = vpow2.f32 %v818_v54  ;;  %v814_v56 = vsub.f32 %v681_v20, %v805_v55 }
 0x2b9   : > { %v820_v57 = vmul.f32 1.442695, %v814_v56 }
 0x2ba   : > { %v810_v58 = vpop.permute.xlu1 %809 }
 0x2bb   : > { %1655 = vpow2.f32 %v820_v57  ;;  %v815_v59 = vsub.f32 %v757_v24, %v810_v58 }
 0x2bd   : > { %v1652_v61 = vpop.eup %1651  ;;  %v822_v62 = vmul.f32 1.442695, %v815_v59 }
 0x2be   : > { %1491 = vmatmul.mubr.msk.f32.vlgmr.msra.gmra.mrb[4].mxu0 %vm426_vm1, %v1652_v61  ;;  %v832_v63 = vsel %vm426_vm1, %v1652_v61, 0.0  ;;  %v860_v13 = vpop.permute.xlu1 %859 }
 0x2bf   : > { %1657 = vpow2.f32 %v822_v62  ;;  %833 = vadd.xlane.f32.xlu1 %v832_v63  ;;  %1499 = vmatpush3.msra.mxu0 %v446_v60  ;;  %v877_v32 = vmul.f32 %v860_v13, %v853_v31 }
 0x2c0   : > { %1500 = vmatprep.mubr.msk.f32.mxu0 %vm1926_vm2, %v1925_v4  ;;  %1659 = vpow2.f32 %v788_v2 }
 0x2c1   : > { %v1654_v1 = vpop.eup %1653  ;;  %1661 = vpow2.f32 %v786_v7 }
 0x2c2   : > { %1496 = vmatmul.mubr.msk.f32.vlgmr.msra.gmra.mrb[4].mxu1 %vm426_vm1, %v1654_v1  ;;  %v835_v3 = vsel %vm426_vm1, %v1654_v1, 0.0 }
 0x2c3   : > { %836 = vadd.xlane.f32.xlu0 %v835_v3  ;;  %1504 = vmatpush3.msra.mxu1 %v447_v0 }
 0x2c4   : > { %1505 = vmatprep.mubr.msk.f32.mxu1 %vm1926_vm2, %v1925_v4  ;;  %v790_v4 = vmul.f32 1.442695, %v783_v45 }
 0x2c5   : > { %v1656_v5 = vpop.eup %1655 }
 0x2c6   : > { %1501 = vmatmul.mubr.msk.f32.vlgmr.msra.gmra.mrb[6].mxu0 %vm426_vm1, %v1656_v5  ;;  %v838_v10 = vsel %vm426_vm1, %v1656_v5, 0.0  ;;  %1663 = vpow2.f32 %v790_v4 }
 0x2c9   : > { %v1658_v6 = vpop.eup %1657 }
 0x2ca   : > { %1506 = vmatmul.mubr.msk.f32.vlgmr.msra.gmra.mrb[6].mxu1 %vm426_vm1, %v1658_v6  ;;  %v1660_v8 = vpop.eup %1659  ;;  %v841_v11 = vsel %vm426_vm1, %v1658_v6, 0.0 }
 0x2cb   : > { %v1662_v9 = vpop.eup %1661  ;;  %v830_v24 = vmul.f32 %v1660_v8, %v826_v23 }
 0x2cc   : > { %v829_v19 = vmul.f32 %v1662_v9, %v825_v17 }
 0x2d0   : > { %869 = vperm.xlu1 %1648, %v1660_v8   ;;  %v1664_v12 = vpop.eup %1663 }
 0x2d1   : > { %v831_v28 = vmul.f32 %v1664_v12, %v827_v26 }
 0x2d9   : > { %864 = vperm.xlu0 %1647, %v1662_v9  }
 0x2f4   : > { %839 = vadd.xlane.f32.xlu1 %v838_v10 }
 0x2f8   : > { %842 = vadd.xlane.f32.xlu1 %v841_v11 }
 0x309   : > { %874 = vperm.xlu1 %1648, %v1664_v12  }
 0x34c   : > { %v834_v16 = vpop.xlane.xlu1 %833 }
 0x34d   : > { %v844_v18 = vadd.f32 %v834_v16, %v828_v15 }
 0x34f   : > { %849 = vst.msk [vmem:[#allocation3] sm:$0xff] %vm417_vm0, %v844_v18 }
 0x350   : > { %v837_v20 = vpop.xlane.xlu0 %836  ;;  %v870_v22 = vpop.permute.xlu1 %869 }
 0x351   : > { %v845_v21 = vadd.f32 %v837_v20, %v829_v19  ;;  %v879_v43 = vmul.f32 %v870_v22, %v855_v39 }
 0x353   : > { %850 = vst.msk [vmem:[#allocation3 + $0x8] sm:$0xff] %vm417_vm0, %v845_v21 }
 0x358   : > { %v865_v34 = vpop.permute.xlu0 %864 }
 0x359   : > { %v878_v38 = vmul.f32 %v865_v34, %v854_v33 }
 0x381   : > { %v840_v25 = vpop.xlane.xlu1 %839 }
 0x382   : > { %v846_v27 = vadd.f32 %v840_v25, %v830_v24 }
 0x384   : > { %851 = vst.msk [vmem:[#allocation3 + $0x10] sm:$0xff] %vm417_vm0, %v846_v27 }
 0x385   : > { %v843_v29 = vpop.xlane.xlu1 %842 }
 0x386   : > { %v847_v30 = vadd.f32 %v843_v29, %v831_v28 }
 0x388   : > { %852 = vst.msk [vmem:[#allocation3 + $0x18] sm:$0xff] %vm417_vm0, %v847_v30 }
 0x389   : > { %v875_v45 = vpop.permute.xlu1 %874 }
 0x38a   : > { %v880_v49 = vmul.f32 %v875_v45, %v856_v44 }
 0x391   : > { %v950_v35 = vpop.f32.mrb[4].mxu0 }
 0x392   : > { %v1173_v36 = vadd.f32 %v950_v35, %v877_v32  ;;  %v1492_v37 = vpop.f32.mrb[5].mxu0 }
 0x394   : > { %1177 = vst.msk [vmem:[#allocation4] sm:$0xff] %vm426_vm1, %v1173_v36 }
 0x395   : > { %v1023_v40 = vpop.f32.mrb[4].mxu1 }
 0x396   : > { %v1174_v41 = vadd.f32 %v1023_v40, %v878_v38  ;;  %v1497_v42 = vpop.f32.mrb[5].mxu1 }
 0x398   : > { %1178 = vst.msk [vmem:[#allocation4 + $0x8] sm:$0xff] %vm426_vm1, %v1174_v41 }
 0x399   : > { %v1096_v46 = vpop.f32.mrb[6].mxu0 }
 0x39a   : > { %v1175_v47 = vadd.f32 %v1096_v46, %v879_v43  ;;  %v1502_v48 = vpop.f32.mrb[7].mxu0 }
 0x39c   : > { %1179 = vst.msk [vmem:[#allocation4 + $0x10] sm:$0xff] %vm426_vm1, %v1175_v47 }
 0x39d   : > { %v1169_v50 = vpop.f32.mrb[6].mxu1 }
 0x39e   : > { %v1176_v51 = vadd.f32 %v1169_v50, %v880_v49  ;;  %v1507_v52 = vpop.f32.mrb[7].mxu1 }
 0x3a0   : > { %1180 = vst.msk [vmem:[#allocation4 + $0x18] sm:$0xff] %vm426_vm1, %v1176_v51 }
 0x3a1 PF: > { %v1190_v53 = vld [vmem:[#allocation3 + $0x10] sm:$0xff]  ;;  %v1188_v54 = vld [vmem:[#allocation3] sm:$0xff]  ;;  %v1191_v55 = vld [vmem:[#allocation3 + $0x18] sm:$0xff]  ;;  %v1928_v56 = vmov 0   ;;  %s2576_s27 = sld [smem:[#allocation25_spill]]  ;;  %s1244_s21 = sshll.u32 %s2354_s5, 4  ;;  %s2444_s21 = int_to_ptr.vmem [resolvable:$true] %s1244_s21 }
 0x3a2   : > { %1666 = vset.pattern.permute.xlu1 %v1928_v56  ;;  %1665 = vset.pattern.permute.xlu0 %v1928_v56  ;;  %1667 = vrcp.f32 %v1190_v53  ;;  %v1189_v57 = vld [vmem:[#allocation3 + $0x8] sm:$0xff]  ;;  %v1196_v63 = vld [vmem:[#allocation4] sm:$0xff]  ;;  %s2577_s11 = sld [smem:[#allocation33_spill]]  ;;  %s1230_s6 = scalar_lea.sflag [#allocation9], %s2304_s0 }
 0x3a3   : > { %1669 = vrcp.f32 %v1188_v54  ;;  %v1198_v62 = vld [vmem:[#allocation4 + $0x10] sm:$0xff]  ;;  %v1197_v6 = vld [vmem:[#allocation4 + $0x8] sm:$0xff]  ;;  %s1775_s18 = scalar_lea.vmem %s2444_s21, 512  ;;  %p2579_p1 = scmp.ne.s32.totalorder %s2562_s2, 0 }
 0x3a4   : > { %1671 = vrcp.f32 %v1191_v55  ;;  %p1776_p6 = scmp.ne.s32.totalorder %s2444_s21, %s1775_s18  ;;  %s1929_s14 = smov [#allocation13]  }
 0x3a5   : > { %1673 = vrcp.f32 %v1189_v57  ;;  %s1779_s20 = sshll.u32 %s1929_s14, 4  ;;  %s1780_s20 = int_to_ptr.vmem [resolvable:$false] %s1779_s20 }
 0x3a6   : > { %p1777_p7 = pnand %p1776_p6, %p2579_p1  ;;  %s1781_s23 = scalar_lea.vmem %s1780_s20, 1024 }
 0x3a7   : > { %v1199_v5 = vld [vmem:[#allocation4 + $0x18] sm:$0xff]  ;;  %s1451_s16 = sshll.u32 %s2576_s27, 9  ;;  %p1782_p13 = scmp.lt.s32.totalorder %s2444_s21, %s1780_s20 }
 0x3a8   : > { %s2578_s22 = smov %s2577_s11  ;;  %s2442_s28 = scalar_lea.hbm %s2577_s11, %s1451_s16 }
 0x3a9   : > { %p1778_p12 = pneg %p1777_p7  ;;  %p1783_p0 = scmp.lt.s32.totalorder %s1781_s23, %s1775_s18 }
 0x3ab   : > { %p1784_p3 = por %p1783_p0, %p1782_p13 }
 0x3ac   : > { %v1668_v58 = vpop.eup %1667 }
 0x3ad   : > { %v1670_v59 = vpop.eup %1669  ;;  %1212 = vperm.xlu1 %1666, %v1668_v58   ;;  %p1785_p4 = pnand %p1784_p3, %p1778_p12 }
 0x3ae   : > { %v1672_v60 = vpop.eup %1671  ;;  %1202 = vperm.xlu0 %1665, %v1670_v59  }
 0x3af   : > { %v1674_v61 = vpop.eup %1673 }
 0x3b1   : > { %1217 = vperm.xlu1 %1666, %v1672_v60  }
 0x3b2   : > { %1207 = vperm.xlu0 %1665, %v1674_v61  }
 0x42c   : > { %v1213_v0 = vpop.permute.xlu1 %1212 }
 0x42d   : > { %v1222_v1 = vmul.f32 %v1213_v0, %v1198_v62  ;;  %v1203_v2 = vpop.permute.xlu0 %1202 }
 0x42e   : > { %v1220_v3 = vmul.f32 %v1203_v2, %v1196_v63 }
 0x42f   : > { %1227 = vst.msk [vmem:[%s2354_s5 + $0x10] sm:$0xff] %vm426_vm1, %v1222_v1 }
 0x430   : > { %1225 = vst.msk [vmem:[%s2354_s5] sm:$0xff] %vm426_vm1, %v1220_v3  ;;  %v1218_v7 = vpop.permute.xlu1 %1217 }
 0x431   : > { %v1223_v8 = vmul.f32 %v1218_v7, %v1199_v5  ;;  %v1208_v9 = vpop.permute.xlu0 %1207 }
 0x432   : > { %v1221_v10 = vmul.f32 %v1208_v9, %v1197_v6 }
 0x433   : > { %1228 = vst.msk [vmem:[%s2354_s5 + $0x18] sm:$0xff] %vm426_vm1, %v1223_v8 }
 0x434   : > { %1226 = vst.msk [vmem:[%s2354_s5 + $0x8] sm:$0xff] %vm426_vm1, %v1221_v10 }
 0x435   : > { %1788 = shalt.err (!%p1785_p4)
}
 0x436   : > { %s1789_s15 = scalar_lea.hbm %s2442_s28, 512  ;;  %s1793_s19 = scalar_lea.hbm %s2578_s22, 1024 }
 0x437   : > { %p1790_p8 = scmp.ne.s32.totalorder %s2442_s28, %s1789_s15  ;;  %p1794_p10 = scmp.lt.u32.totalorder %s2442_s28, %s2578_s22 }
 0x438   : > { %p1795_p2 = scmp.lt.u32.totalorder %s1793_s19, %s1789_s15  ;;  %p1797_p6 = scmp.lt.u32.totalorder %s1789_s15, %s2442_s28 }
 0x439   : > { %p1791_p5 = pnand %p1790_p8, %p2579_p1 }
 0x43a   : > { %p1796_p11 = por %p1795_p2, %p1794_p10 }
 0x43b   : > { %p1792_p9 = pneg %p1791_p5 }
 0x43c   : > { %p1798_p7 = por %p1797_p6, %p1796_p11 }
 0x43e   : > { %p1799_p12 = pnand %p1798_p7, %p1792_p9 }
 0x440   : > { %1802 = shalt.err (!%p1799_p12)
}
 0x441   : > { %s1930_s5 = smov 128   ;;  %s1931_s27 = smov 8  }
 0x442   : > { %1518 = dma.vmem_to_hbm [thread:$0]  (%p2579_p1), %s2444_s21, 512, %s2442_s28, %s1230_s6, %s1930_s5, %s1930_s5, %s1931_s27  }
 0x443 PF: > { %s1259_s16 = sand.u32 1, %s1895_s8   ;;  %p2580_p13 = scmp.ne.s32.totalorder %s2563_s4, 0 }
 0x444   : > { %p2581_p0 = scmp.ge.s32.totalorder %s1915_s13, 2  ;;  %s1260_s17 = scalar_lea.sflag [#allocation9], %s1259_s16 }
 0x446   : > { %p1535_p3 = pnand %p2581_p0, %p2580_p13 }
 0x448   : > { %1866 = dma.done.wait (!%p1535_p3), %s1260_s17, 512  }
 0x449   : > { %1868 = vsyncadd (!%p1535_p3), %s1260_s17, 4294966784  ;;  %s28_s13 = sadd.s32 1, %s1915_s13   ;;  %s2582_s25 = sld [smem:[#allocation29_spill]] }
 0x44a   : > { %p25_p4 = scmp.ge.s32.totalorder %s28_s13, 4   ;;  %s2583_s2 = sld [smem:[#allocation23_spill]] }
 0x44b   : > { %s2584_s0 = sld [smem:[#allocation28_spill]]  ;;  %s2585_s21 = sld [smem:[#allocation24_spill]] }
 0x44c   : > { %s2586_s10 = sld [smem:[#allocation30_spill]]  ;;  %s2587_s11 = sld [smem:[#allocation26_spill]] }
 0x44d   : > { %s2588_s12 = sld [smem:[#allocation27_spill]]  ;;  %s2589_s28 = smov %s1875_s29 }
 0x44e   : > { %s2590_s29 = smov %s1879_s30  ;;  %s2592_s6 = smov %s1887_s7 }
 0x44f   : > { %s2591_s30 = smov %s2582_s25  ;;  %s2594_s8 = smov %s1899_s9 }
 0x450   : > { %s2593_s7 = smov %s2583_s2  ;;  %27 = sbr.rel (!%p25_p4) target bundleno = 24 (0x18), region = 120 }
 0x451   : > { %s2595_s9 = smov %s2585_s21 }
 0x457   :  { %1265 = vsyncpa [#allocation8], 1 }
 0x458   :  { %1267 = vsyncpa [#allocation8 + $0x1], 1 }
 0x459   :  { %1268 = vsyncpa [#allocation11], 1 }
 0x45a   :  { %1270 = vsyncpa [#allocation11 + $0x1], 1 }
 0x45b   :  { %1271 = vsyncpa [#allocation9], 1 }
 0x45c   :  { %1273 = vsyncpa [#allocation9 + $0x1], 1 }

</bundles_post_ra>
